<compile_context>
chip_gen: v5e
topology: v5e:2x2
jax: 0.10.0
libtpu: 0.0.40
codegen_flags: <defaults>
</compile_context>

<pallas_src>
import jax
import jax.numpy as jnp
from jax.experimental import pallas as pl
from jax.experimental.pallas import tpu as pltpu

LOGIT_SCALE = 100.0  # CLIP's exp(log_logit_scale) default ~= 100
EPS = 1e-12

_TILE_VMEM_BUDGET = 40 * 1024 * 1024   # conservative tile budget (per TC, all chips)
_VMEM_LIMIT = 48 * 1024 * 1024         # scoped VMEM limit: < 64 MiB physical on v7x


def clip_head_kernel(x_ref, w_ref, xinv_ref, winv_ref, o_ref):
    """One (batch-tile, class-tile) block of cosine-similarity logits.

    x_ref:    (tb, E)   VMEM, input dtype (e.g. bf16)
    w_ref:    (tn, E)   VMEM, input dtype (e.g. bf16)
    xinv_ref: (tb, 1)   VMEM, fp32: logit_scale / ||x_row||   (hoisted to wrapper)
    winv_ref: (1, tn)   VMEM, fp32: 1 / ||w_row||             (hoisted to wrapper)
    o_ref:    (tb, tn)  VMEM, output dtype
    """
    # Last-dim contraction on the MXU (no transpose copy), fp32 accumulation.
    logits = jax.lax.dot_general(
        x_ref[...], w_ref[...],
        dimension_numbers=(((1,), (1,)), ((), ())),
        preferred_element_type=jnp.float32,
    )
    # Fused post-scale: per-row and per-column inverse norms (both precomputed).
    o_ref[...] = (logits * xinv_ref[...] * winv_ref[...]).astype(o_ref.dtype)


def _cdiv(a, b):
    return (a + b - 1) // b


def _round_up(n, m):
    return _cdiv(n, m) * m


def _select_tiles(B, C, E, in_bytes, w_bytes, out_bytes, tile_b, tile_n):
    # Batch tile: minimize padding waste, multiple of 8 sublanes, capped at tile_b.
    tb = _round_up(_cdiv(B, _cdiv(B, tile_b)), 8)

    def tiles_bytes(tn):
        # double-buffered x, w, out blocks + the tiny fp32 scale rows
        return (2 * tb * E * in_bytes
                + 2 * tn * E * w_bytes
                + 2 * tb * tn * out_bytes
                + 2 * (tb + tn) * 4)

    c128 = _round_up(C, 128)
    if tiles_bytes(c128) <= _TILE_VMEM_BUDGET:
        tn = c128                                    # weights fully VMEM-resident
    else:
        avail = _TILE_VMEM_BUDGET - 2 * tb * E * in_bytes - 2 * tb * 4
        denom = 2 * E * w_bytes + 2 * tb * out_bytes + 8
        tn = max(128, (avail // denom) // 128 * 128)
        tn = min(tn, max(tile_n, 128), c128)

    # Keep >= 2 parallel tiles for dual-TC chips (v7x) when the batch fits one tile;
    # each class tile is still read only once so total HBM traffic is unchanged.
    if _round_up(B, tb) // tb == 1 and tn == c128 and c128 % 256 == 0:
        tn = c128 // 2
    return tb, tn


def clip_head(x, weights, *, logit_scale=LOGIT_SCALE, tile_b=256, tile_n=2048,
              out_dtype=jnp.float32):
    """x: (B, E) embeddings; weights: (C, E) class embeddings -> (B, C) logits."""
    B, E = x.shape
    C, E2 = weights.shape
    assert E == E2

    in_bytes = x.dtype.itemsize
    w_bytes = weights.dtype.itemsize
    out_bytes = jnp.dtype(out_dtype).itemsize
    tb, tn = _select_tiles(B, C, E, in_bytes, w_bytes, out_bytes, tile_b, tile_n)

    B_pad = _round_up(B, tb)
    C_pad = _round_up(C, tn)

    # Hoisted once-per-call fp32 inverse norms (logit scale folded into the row scale).
    xf = x.astype(jnp.float32)
    wf = weights.astype(jnp.float32)
    x_inv = jax.lax.rsqrt(jnp.sum(xf * xf, axis=-1, keepdims=True) + EPS) * logit_scale  # (B,1)
    w_inv = jax.lax.rsqrt(jnp.sum(wf * wf, axis=-1, keepdims=True) + EPS).T              # (1,C)

    # Zero-pad to tile multiples; padded rows/cols produce zero logits and are sliced off.
    x_p = x if B_pad == B else jnp.pad(x, ((0, B_pad - B), (0, 0)))
    w_p = weights if C_pad == C else jnp.pad(weights, ((0, C_pad - C), (0, 0)))
    xinv_p = x_inv if B_pad == B else jnp.pad(x_inv, ((0, B_pad - B), (0, 0)))
    winv_p = w_inv if C_pad == C else jnp.pad(w_inv, ((0, 0), (0, C_pad - C)))

    n_c, n_b = C_pad // tn, B_pad // tb
    grid = (n_c, n_b)   # class tiles OUTER -> the big weight stream is never re-read

    cost = pl.CostEstimate(
        flops=2 * B_pad * C_pad * E,
        transcendentals=0,
        bytes_accessed=(B_pad * E * in_bytes + C_pad * E * w_bytes
                        + B_pad * 4 + C_pad * 4 + B_pad * C_pad * out_bytes),
    )

    out = pl.pallas_call(
        clip_head_kernel,
        out_shape=jax.ShapeDtypeStruct((B_pad, C_pad), out_dtype),
        grid=grid,
        in_specs=[
            pl.BlockSpec((tb, E), lambda i, j: (j, 0)),   # x: batch-tiled (inner axis)
            pl.BlockSpec((tn, E), lambda i, j: (i, 0)),   # W: class-tiled (outer axis)
            pl.BlockSpec((tb, 1), lambda i, j: (j, 0)),   # per-row inv norms * scale
            pl.BlockSpec((1, tn), lambda i, j: (0, i)),   # per-class inv norms
        ],
        out_specs=pl.BlockSpec((tb, tn), lambda i, j: (j, i)),
        compiler_params=pltpu.CompilerParams(
            dimension_semantics=("parallel", "parallel"),
            vmem_limit_bytes=_VMEM_LIMIT,
        ),
        cost_estimate=cost,
    )(x_p, w_p, xinv_p, winv_p)

    return out[:B, :C]


if __name__ == "__main__":
    # Small, deterministic synthetic setup consistent with forward():
    # x: (batch_dim, emb_dim); _weights: (num_classes, emb_dim).
    batch_dim, emb_dim, num_classes = 16, 256, 32

    key = jax.random.PRNGKey(0)
    kx, kw = jax.random.split(key)
    # bf16 operands exercise the MXU-native path; norms/accumulation stay fp32.
    x = jax.random.normal(kx, (batch_dim, emb_dim), dtype=jnp.float32).astype(jnp.bfloat16)
    weights = jax.random.normal(kw, (num_classes, emb_dim), dtype=jnp.float32).astype(jnp.bfloat16)

    out = clip_head(x, weights)
    out = jax.block_until_ready(out)

    # Reference in plain JAX: same math (fp32 norms + fp32-accumulated matmul) on the
    # same bf16-valued inputs.
    xf = x.astype(jnp.float32)
    wf = weights.astype(jnp.float32)
    x_inv = jax.lax.rsqrt(jnp.sum(xf * xf, axis=-1, keepdims=True) + EPS)
    w_inv = jax.lax.rsqrt(jnp.sum(wf * wf, axis=-1, keepdims=True) + EPS)
    ref = LOGIT_SCALE * (xf @ wf.T) * x_inv * w_inv.T

    assert out.shape == (batch_dim, num_classes)
    assert out.dtype == jnp.float32
    assert jnp.allclose(out, ref, atol=1e-2, rtol=1e-2)

    print("KERNEL_OK")
</pallas_src>

<mosaic_0001>
module attributes {stable_mosaic.version = 11 : i64} {
  func.func @clip_head_kernel(%arg0: i32, %arg1: i32, %arg2: memref<16x256xbf16, #tpu.memory_space<vmem>>, %arg3: memref<128x256xbf16, #tpu.memory_space<vmem>>, %arg4: memref<16x1xf32, #tpu.memory_space<vmem>>, %arg5: memref<1x128xf32, #tpu.memory_space<vmem>>, %arg6: memref<16x128xf32, #tpu.memory_space<vmem>>) attributes {dimension_semantics = [#tpu.dimension_semantics<parallel>, #tpu.dimension_semantics<parallel>], iteration_bounds = array<i64: 1, 1>, scalar_prefetch = 0 : i64, scratch_operands = 0 : i64, tpu.core_type = #tpu.core_type<tc>, window_params = [{transform_indices = @transform_0, window_bounds = array<i64: 16, 256>}, {transform_indices = @transform_1, window_bounds = array<i64: 128, 256>}, {transform_indices = @transform_2, window_bounds = array<i64: 16, 1>}, {transform_indices = @transform_3, window_bounds = array<i64: 1, 128>}, {transform_indices = @transform_4, window_bounds = array<i64: 16, 128>}]} {
    %c0 = arith.constant 0 : index
    %c0_0 = arith.constant 0 : index
    %0 = vector.load %arg2[%c0, %c0_0] : memref<16x256xbf16, #tpu.memory_space<vmem>>, vector<16x256xbf16>
    %c0_1 = arith.constant 0 : index
    %c0_2 = arith.constant 0 : index
    %1 = vector.load %arg3[%c0_1, %c0_2] : memref<128x256xbf16, #tpu.memory_space<vmem>>, vector<128x256xbf16>
    %cst = arith.constant dense<0.000000e+00> : vector<16x128xf32>
    %2 = tpu.matmul %0, %1, %cst {dimension_numbers = #tpu.dot_dimension_numbers<[1], [1], [0], [0], [0, 0, 1, 0], [], []>} : vector<16x256xbf16>, vector<128x256xbf16>, vector<16x128xf32> -> vector<16x128xf32>
    %c0_3 = arith.constant 0 : index
    %c0_4 = arith.constant 0 : index
    %3 = vector.load %arg4[%c0_3, %c0_4] : memref<16x1xf32, #tpu.memory_space<vmem>>, vector<16x1xf32>
    %4 = vector.broadcast %3 : vector<16x1xf32> to vector<16x128xf32>
    %5 = arith.mulf %2, %4 : vector<16x128xf32>
    %c0_5 = arith.constant 0 : index
    %c0_6 = arith.constant 0 : index
    %6 = vector.load %arg5[%c0_5, %c0_6] : memref<1x128xf32, #tpu.memory_space<vmem>>, vector<1x128xf32>
    %7 = vector.broadcast %6 : vector<1x128xf32> to vector<16x128xf32>
    %8 = arith.mulf %5, %7 : vector<16x128xf32>
    %c0_7 = arith.constant 0 : index
    %c0_8 = arith.constant 0 : index
    %9 = vector.load %arg6[%c0_7, %c0_8] : memref<16x128xf32, #tpu.memory_space<vmem>>, vector<16x128xf32>
    tpu.vector_store %arg6[%c0_7, %c0_8], %8 {strides = array<i32>} : memref<16x128xf32, #tpu.memory_space<vmem>>, vector<16x128xf32>,
    return
  }
  func.func @transform_0(%arg0: i32, %arg1: i32) -> (i32, i32) {
    %c0_i32 = arith.constant 0 : i32
    %c0_i32_0 = arith.constant 0 : i32
    return %arg1, %c0_i32 : i32, i32
  }
  func.func @transform_1(%arg0: i32, %arg1: i32) -> (i32, i32) {
    %c0_i32 = arith.constant 0 : i32
    %c0_i32_0 = arith.constant 0 : i32
    return %arg0, %c0_i32 : i32, i32
  }
  func.func @transform_2(%arg0: i32, %arg1: i32) -> (i32, i32) {
    %c0_i32 = arith.constant 0 : i32
    %c0_i32_0 = arith.constant 0 : i32
    return %arg1, %c0_i32 : i32, i32
  }
  func.func @transform_3(%arg0: i32, %arg1: i32) -> (i32, i32) {
    %c0_i32 = arith.constant 0 : i32
    %c0_i32_0 = arith.constant 0 : i32
    return %c0_i32, %arg0 : i32, i32
  }
  func.func @transform_4(%arg0: i32, %arg1: i32) -> (i32, i32) {
    %c0_i32 = arith.constant 0 : i32
    return %arg1, %arg0 : i32, i32
  }
}

</mosaic_0001>

<bundles_post_ra>
// kernel: tpu_custom_call.1
= control target key start
LH: loop header
LB: loop body
LE: loop exit
PB: predicated region body
PF: predicated region fallthrough
CT: control target
= control target key end

     0   :  { %9 = vsyncpa [#allocation3], 0  ;;  %s423_s0 = inlined_call_operand.vmem [shape: bf16[16,256], index: 0, kind: input, shape index: {}]   ;;  %s424_s1 = inlined_call_operand.hbm [shape: bf16[128,256], index: 1, kind: input, shape index: {}]   ;;  %s425_s2 = inlined_call_operand.vmem [shape: f32[16,1], index: 2, kind: input, shape index: {}]   ;;  %s426_s3 = inlined_call_operand.vmem [shape: f32[1,128], index: 3, kind: input, shape index: {}]   ;;  %s427_s4 = inlined_call_operand.hbm [shape: f32[16,128], index: 4, kind: output, shape index: {}]  }
   0x1   :  { %10 = vsyncpa [#allocation4], 0  ;;  %s17_s17 = sshll.u32 %s424_s1, 4  ;;  %s360_s18 = smov [#allocation2]   ;;  %s18_s17 = int_to_ptr.hbm [resolvable:$true] %s17_s17 }
   0x2   :  { %s19_s19 = sshll.u32 %s360_s18, 4  ;;  %s361_s20 = smov 128   ;;  %s20_s19 = int_to_ptr.vmem [resolvable:$true] %s19_s19 }
   0x3   :  { %s362_s21 = smov 8  }
   0x4   :  { %25 = dma.hbm_to_vmem [thread:$0]  %s18_s17, 2048, %s20_s19, [#allocation3], %s361_s20, %s361_s20, %s362_s21  }
   0x5   :  { %356 = dma.done.wait [#allocation3], 2048  }
   0x6   :  { %357 = vsyncadd [#allocation3], 4294965248  ;;  %v277_v0 = vld [vmem:[#allocation2 + $0x70] sm:$0xf]  ;;  %v300_v1 = vld [vmem:[#allocation2 + $0x74] sm:$0xf0] }
   0x7   :  { %v299_v2 = vld [vmem:[#allocation2 + $0x74] sm:$0xf]  ;;  %v278_v3 = vor.u32 %v300_v1, %v277_v0  ;;  %v279_v4 = vld [vmem:[#allocation2 + $0x78] sm:$0xf0]  ;;  %v269_v6 = vld [vmem:[#allocation2 + $0x60] sm:$0xf] }
   0x8   :  { %v282_v5 = vor.u32 %v299_v2, %v279_v4  ;;  %v298_v7 = vld [vmem:[#allocation2 + $0x64] sm:$0xf0]  ;;  %v297_v8 = vld [vmem:[#allocation2 + $0x64] sm:$0xf]  ;;  %v271_v9 = vld [vmem:[#allocation2 + $0x68] sm:$0xf0] }
   0x9   :  { %142 = vmatpush.bf16.xpose.msra.mxu0 %v278_v3  ;;  %v270_v10 = vor.u32 %v298_v7, %v269_v6  ;;  %v274_v11 = vor.u32 %v297_v8, %v271_v9  ;;  %v261_v12 = vld [vmem:[#allocation2 + $0x50] sm:$0xf]  ;;  %v296_v13 = vld [vmem:[#allocation2 + $0x54] sm:$0xf0]  ;;  %v295_v14 = vld [vmem:[#allocation2 + $0x54] sm:$0xf] }
   0xa   :  { %156 = vmatpush.bf16.xpose.msra.mxu1 %v282_v5  ;;  %v263_v15 = vld [vmem:[#allocation2 + $0x58] sm:$0xf0]  ;;  %v262_v16 = vor.u32 %v296_v13, %v261_v12  ;;  %v253_v18 = vld [vmem:[#allocation2 + $0x40] sm:$0xf]  ;;  %v294_v19 = vld [vmem:[#allocation2 + $0x44] sm:$0xf0] }
   0xb   :  { %v266_v17 = vor.u32 %v295_v14, %v263_v15  ;;  %v293_v20 = vld [vmem:[#allocation2 + $0x44] sm:$0xf]  ;;  %v255_v21 = vld [vmem:[#allocation2 + $0x48] sm:$0xf0]  ;;  %v254_v22 = vor.u32 %v294_v19, %v253_v18  ;;  %v245_v24 = vld [vmem:[#allocation2 + $0x30] sm:$0xf] }
   0xc   :  { %v258_v23 = vor.u32 %v293_v20, %v255_v21  ;;  %v292_v25 = vld [vmem:[#allocation2 + $0x34] sm:$0xf0]  ;;  %v291_v26 = vld [vmem:[#allocation2 + $0x34] sm:$0xf]  ;;  %v247_v27 = vld [vmem:[#allocation2 + $0x38] sm:$0xf0] }
   0xd   :  { %v246_v28 = vor.u32 %v292_v25, %v245_v24  ;;  %v250_v29 = vor.u32 %v291_v26, %v247_v27  ;;  %v170_v30 = vld [vmem:[%s425_s2] sm:$0xff]  ;;  %v290_v32 = vld [vmem:[#allocation2 + $0x24] sm:$0xf0]  ;;  %v363_v33 = vmov 0   ;;  %v239_v35 = vld [vmem:[#allocation2 + $0x28] sm:$0xf0] }
   0xe   :  { %v237_v31 = vld [vmem:[#allocation2 + $0x20] sm:$0xf]  ;;  %306 = vset.pattern.permute.xlu0 %v363_v33  ;;  %v289_v34 = vld [vmem:[#allocation2 + $0x24] sm:$0xf]  ;;  %v171_v38 = vld [vmem:[%s425_s2 + $0x8] sm:$0xff]  ;;  %s198_s11 = sshll.u32 %s427_s4, 4  ;;  %s199_s11 = int_to_ptr.hbm [resolvable:$true] %s198_s11 }
   0xf   :  { %174 = vperm.xlu0 %306, %v170_v30   ;;  %v238_v36 = vor.u32 %v290_v32, %v237_v31  ;;  %v242_v37 = vor.u32 %v289_v34, %v239_v35  ;;  %v229_v39 = vld [vmem:[#allocation2 + $0x10] sm:$0xf]  ;;  %v288_v40 = vld [vmem:[#allocation2 + $0x14] sm:$0xf0]  ;;  %v287_v41 = vld [vmem:[#allocation2 + $0x14] sm:$0xf] }
  0x10   :  { %v231_v42 = vld [vmem:[#allocation2 + $0x18] sm:$0xf0]  ;;  %v230_v43 = vor.u32 %v288_v40, %v229_v39  ;;  %v221_v45 = vld [vmem:[#allocation2] sm:$0xf]  ;;  %v286_v46 = vld [vmem:[#allocation2 + $0x4] sm:$0xf0] }
  0x11   :  { %143 = vmatpush.bf16.xpose.msra.mxu0 %v270_v10  ;;  %v234_v44 = vor.u32 %v287_v41, %v231_v42  ;;  %v285_v47 = vld [vmem:[#allocation2 + $0x4] sm:$0xf]  ;;  %v223_v48 = vld [vmem:[#allocation2 + $0x8] sm:$0xf0]  ;;  %v222_v49 = vor.u32 %v286_v46, %v221_v45  ;;  %v213_v51 = vld [vmem:[%s423_s0] sm:$0xf] }
  0x12   :  { %157 = vmatpush.bf16.xpose.msra.mxu1 %v274_v11  ;;  %v226_v50 = vor.u32 %v285_v47, %v223_v48  ;;  %v284_v52 = vld [vmem:[%s423_s0 + $0x4] sm:$0xf0]  ;;  %v283_v53 = vld [vmem:[%s423_s0 + $0x4] sm:$0xf]  ;;  %v215_v54 = vld [vmem:[%s423_s0 + $0x8] sm:$0xf0] }
  0x13   :  { %v214_v55 = vor.u32 %v284_v52, %v213_v51  ;;  %v218_v56 = vor.u32 %v283_v53, %v215_v54  ;;  %v307_v61 = vld [vmem:[%s426_s3] ss:$0 sm:$0xff]  ;;  %s364_s0 = smov [#allocation5]  }
  0x14   :  { %s196_s8 = sshll.u32 %s364_s0, 4  ;;  %s197_s8 = int_to_ptr.vmem [resolvable:$true] %s196_s8 }
  0x17   :  { %179 = vperm.xlu0 %306, %v171_v38  }
  0x19   :  { %144 = vmatpush.bf16.xpose.msra.mxu0 %v262_v16 }
  0x1a   :  { %158 = vmatpush.bf16.xpose.msra.mxu1 %v266_v17 }
  0x21   :  { %145 = vmatpush.bf16.xpose.msra.mxu0 %v254_v22 }
  0x22   :  { %159 = vmatpush.bf16.xpose.msra.mxu1 %v258_v23 }
  0x29   :  { %146 = vmatpush.bf16.xpose.msra.mxu0 %v246_v28 }
  0x2a   :  { %160 = vmatpush.bf16.xpose.msra.mxu1 %v250_v29 }
  0x31   :  { %147 = vmatpush.bf16.xpose.msra.mxu0 %v238_v36 }
  0x32   :  { %161 = vmatpush.bf16.xpose.msra.mxu1 %v242_v37 }
  0x39   :  { %148 = vmatpush.bf16.xpose.msra.mxu0 %v230_v43 }
  0x3a   :  { %162 = vmatpush.bf16.xpose.msra.mxu1 %v234_v44 }
  0x41   :  { %149 = vmatpush.bf16.xpose.msra.mxu0 %v222_v49 }
  0x42   :  { %163 = vmatpush.bf16.xpose.msra.mxu1 %v226_v50 }
  0x48   :  { %150 = vmatmul.bf16.vlgmr.msra.gmra.mxu0 %v214_v55 }
  0x49   :  { %164 = vmatmul.bf16.vlgmr.msra.gmra.mxu1 %v218_v56 }
  0x81   :  { %v175_v58 = vpop.permute.xlu0 %174 }
  0x89   :  { %v180_v3 = vpop.permute.xlu0 %179 }
  0xc5   :  { %v151_v57 = vpop.f32.mrf.mxu0 }
  0xc6   :  { %v165_v59 = vpop.f32.mrf.mxu1 }
  0xc7   :  { %v166_v60 = vadd.f32 %v165_v59, %v151_v57 }
  0xc9   :  { %v182_v62 = vmul.f32 %v175_v58, %v166_v60 }
  0xcb   :  { %v188_v63 = vmul.f32 %v307_v61, %v182_v62 }
  0xcd   :  { %190 = vst [vmem:[#allocation5] sm:$0xff] %v188_v63  ;;  %v153_v0 = vpop.f32.mrf.mxu0 }
  0xce   :  { %v167_v1 = vpop.f32.mrf.mxu1 }
  0xcf   :  { %v168_v2 = vadd.f32 %v167_v1, %v153_v0 }
  0xd1   :  { %v183_v4 = vmul.f32 %v180_v3, %v168_v2 }
  0xd3   :  { %v189_v5 = vmul.f32 %v307_v61, %v183_v4 }
  0xd5   :  { %191 = vst [vmem:[#allocation5 + $0x8] sm:$0xff] %v189_v5 }
  0xd6   :  { %204 = dma.vmem_to_hbm [thread:$0]  %s197_s8, 256, %s199_s11, [#allocation4], %s361_s20, %s361_s20, %s362_s21  }
  0xd7   :  { %358 = dma.done.wait [#allocation4], 256  }
  0xd8   :  { %359 = vsyncadd [#allocation4], 4294967040 }
  0xd9   :  { %209 = vsyncpa [#allocation3], 1 }
  0xda   :  { %210 = vsyncpa [#allocation4], 1 }

</bundles_post_ra>
